<compile_context>
chip_gen: v7x
topology: tpu7x:2x2x1
jax: 0.10.0
libtpu: 0.0.40
codegen_flags: <defaults>
</compile_context>

<pallas_src>
import functools

import jax
import jax.numpy as jnp
from jax.experimental import pallas as pl
from jax.experimental.pallas import tpu as pltpu


def _round_up(x, m):
    return (x + m - 1) // m * m


def _gene_inference_kernel(yz_ref, w1_ref, b1_ref, w2_ref, b2_ref,
                           w3_ref, b3_ref, logits_ref, probs_ref):
    # Layers 1-2 are tiny (D0 -> 2*D0 -> 4*D0); recomputing them per gene tile
    # is a few % extra MXU work (hidden under the W3/output DMA) and keeps both
    # grid axes independent ("parallel").
    w1 = w1_ref[...]
    h1 = jnp.dot(yz_ref[...], w1, preferred_element_type=jnp.float32) + b1_ref[...]
    h1 = jnp.where(h1 > 0, h1, 0.2 * h1)                  # LeakyReLU(0.2), f32 VPU
    w2 = w2_ref[...]
    h2 = jnp.dot(h1.astype(w2.dtype), w2,
                 preferred_element_type=jnp.float32) + b2_ref[...]
    h2 = jnp.where(h2 > 0, h2, 0.2 * h2)                  # LeakyReLU(0.2)
    # Dropout(p=0.2): identity in eval mode.

    # Final layer: stream W3 gene tiles; lane-dense (TM, TN) output stores.
    w3 = w3_ref[...]
    logits = jnp.dot(h2.astype(w3.dtype), w3,
                     preferred_element_type=jnp.float32) + b3_ref[...]
    logits_ref[...] = logits.astype(logits_ref.dtype)
    # sigmoid goes to the EUP slot (~free vs MXU); stored narrow (bf16 default)
    # to cut HBM writes on this output-bandwidth-bound kernel.
    probs_ref[...] = jax.nn.sigmoid(logits).astype(probs_ref.dtype)


def prepare_params(params, *, compute_dtype=jnp.bfloat16):
    """One-time weight cast/pad, hoisted out of the per-forward path.

    * matmul operands cast to `compute_dtype` (bf16 halves the W3 HBM read;
      the MXU accumulates in f32 either way),
    * biases kept f32 (pointwise math stays f32),
    * W3/b3 gene axis zero-padded to a multiple of 128 (lane-dense stores).
    Call once at init; pass the result to gene_inference_forward.
    """
    G = params["w3"].shape[1]
    G_pad = _round_up(G, 128)
    pad_g = ((0, 0), (0, G_pad - G))
    return {
        "w1": params["w1"].astype(compute_dtype),
        "b1": params["b1"].reshape(1, -1).astype(jnp.float32),
        "w2": params["w2"].astype(compute_dtype),
        "b2": params["b2"].reshape(1, -1).astype(jnp.float32),
        "w3": jnp.pad(params["w3"].astype(compute_dtype), pad_g),
        "b3": jnp.pad(params["b3"].reshape(1, -1).astype(jnp.float32), pad_g),
    }


@functools.partial(jax.jit, static_argnames=("n_gene", "probs_dtype"))
def gene_inference_forward(y, z, prepped, *, n_gene, probs_dtype=jnp.bfloat16):
    """gene_inference MLP as a tiled, pipelined Pallas kernel.

    y: (B, nCluster), z: (B, nLatent); prepped: output of prepare_params.
    Returns (logits f32, probs) with probs in `probs_dtype`; logits are the
    Binomial(total_count=2) parameterization, probs = sigmoid(logits).
    """
    B, nC = y.shape
    nL = z.shape[1]
    D0 = nC + nL
    w1, b1 = prepped["w1"], prepped["b1"]
    w2, b2 = prepped["w2"], prepped["b2"]
    w3, b3 = prepped["w3"], prepped["b3"]
    H1, H2, G_pad = w1.shape[1], w2.shape[1], w3.shape[1]
    compute_dtype = w1.dtype

    # Batch tile: 256 when the 128-padded batch is already a multiple of 256
    # (fills the 256-high MXU on v6e/v7x, halves W3 re-streams), else 128;
    # tiny batches use round_up(B, 8) so no padded output rows are written.
    B8 = _round_up(B, 8)
    if B8 < 128:
        TM = B8
    elif _round_up(B, 128) % 256 == 0:
        TM = 256
    else:
        TM = 128
    B_pad = _round_up(B, TM)

    # Gene tile: up to 2048 lanes to amortize the ~0.35 us/step grid overhead.
    # G is padded only to a multiple of 128; grid uses cdiv (partial last
    # block), so a big TN never forces extra padded output columns.
    TN = min(2048, G_pad)
    gj = pl.cdiv(G_pad, TN)
    grid = (B_pad // TM, gj)

    # Concat once in the wrapper (no in-kernel cross-lane concat); cast the
    # (tiny) activations to the matmul operand dtype here as well.
    yz = jnp.concatenate([y, z], axis=1).astype(compute_dtype)
    if B_pad != B:
        yz = jnp.pad(yz, ((0, B_pad - B), (0, 0)))

    in_specs = [
        pl.BlockSpec((TM, D0), lambda i, j: (i, 0)),   # yz batch tile (resident over j)
        pl.BlockSpec((D0, H1), lambda i, j: (0, 0)),   # W1 resident
        pl.BlockSpec((1, H1), lambda i, j: (0, 0)),    # b1 resident
        pl.BlockSpec((H1, H2), lambda i, j: (0, 0)),   # W2 resident
        pl.BlockSpec((1, H2), lambda i, j: (0, 0)),    # b2 resident
        pl.BlockSpec((H2, TN), lambda i, j: (0, j)),   # W3 streamed over genes
        pl.BlockSpec((1, TN), lambda i, j: (0, j)),    # b3 streamed over genes
    ]
    out_specs = (
        pl.BlockSpec((TM, TN), lambda i, j: (i, j)),   # logits (f32)
        pl.BlockSpec((TM, TN), lambda i, j: (i, j)),   # sigmoid(logits) (narrow)
    )
    out_shape = (
        jax.ShapeDtypeStruct((B_pad, G_pad), jnp.float32),
        jax.ShapeDtypeStruct((B_pad, G_pad), probs_dtype),
    )

    wbytes = jnp.dtype(compute_dtype).itemsize
    pbytes = jnp.dtype(probs_dtype).itemsize
    n_btiles = B_pad // TM
    cost = pl.CostEstimate(
        flops=2 * B_pad * ((D0 * H1 + H1 * H2) * gj + H2 * G_pad),
        transcendentals=B_pad * G_pad,
        bytes_accessed=(B_pad * D0 * wbytes
                        + (D0 * H1 + H1 * H2) * wbytes + (H1 + H2) * 4
                        + n_btiles * (H2 * G_pad * wbytes + G_pad * 4)
                        + B_pad * G_pad * (4 + pbytes)),
    )

    logits_p, probs_p = pl.pallas_call(
        _gene_inference_kernel,
        grid=grid,
        in_specs=in_specs,
        out_specs=out_specs,
        out_shape=out_shape,
        compiler_params=pltpu.CompilerParams(
            # Both axes independent (layers 1-2 recomputed per tile) -> both
            # shardable across v7x's two TensorCores.
            dimension_semantics=("parallel", "parallel"),
            # Worst-case footprint (TM=256, TN=2048, bf16 W3/probs) ~9 MiB;
            # 32 MiB keeps headroom everywhere incl. v5e's 16 MiB scoped default.
            vmem_limit_bytes=32 * 1024 * 1024,
        ),
        cost_estimate=cost,
    )(yz, w1, b1, w2, b2, w3, b3)

    # NOTE: if the consumer only needs the Binomial logits, drop probs (and its
    # out_spec) here to halve the remaining output HBM traffic.
    return logits_p[:B, :n_gene], probs_p[:B, :n_gene]


def init_params(key, nGene, nLatent, nCluster):
    """PyTorch-style Linear init: U(-1/sqrt(fan_in), 1/sqrt(fan_in)).

    Weights are created as (in_features, out_features) — i.e. already the
    transpose of torch's (out, in) layout — so the kernel does x @ W.
    """
    d0 = nCluster + nLatent
    h1 = 2 * d0
    h2 = 4 * d0

    def linear(k, fan_in, fan_out):
        kw, kb = jax.random.split(k)
        bound = 1.0 / jnp.sqrt(jnp.float32(fan_in))
        w = jax.random.uniform(kw, (fan_in, fan_out), jnp.float32, -bound, bound)
        b = jax.random.uniform(kb, (1, fan_out), jnp.float32, -bound, bound)
        return w, b

    k1, k2, k3 = jax.random.split(key, 3)
    w1, b1 = linear(k1, d0, h1)
    w2, b2 = linear(k2, h1, h2)
    w3, b3 = linear(k3, h2, nGene)
    return {"w1": w1, "b1": b1, "w2": w2, "b2": b2, "w3": w3, "b3": b3}


def reference_forward(y, z, params):
    """Pure-JAX reference mirroring the PyTorch module (eval mode)."""
    hi = jax.lax.Precision.HIGHEST
    yz = jnp.concatenate([y, z], axis=1)
    h1 = jnp.dot(yz, params["w1"], precision=hi) + params["b1"]
    h1 = jnp.where(h1 > 0, h1, 0.2 * h1)
    h2 = jnp.dot(h1, params["w2"], precision=hi) + params["b2"]
    h2 = jnp.where(h2 > 0, h2, 0.2 * h2)
    logits = jnp.dot(h2, params["w3"], precision=hi) + params["b3"]
    return logits, jax.nn.sigmoid(logits)


if __name__ == "__main__":
    # ---- test 1: small shapes, single tile, f32 operands (tight check) ----
    nCluster, nLatent, nGene = 4, 28, 40      # D0=32, H1=64, H2=128
    B = 8

    key = jax.random.PRNGKey(0)
    ky, kz, kp = jax.random.split(key, 3)
    y = jax.nn.softmax(jax.random.normal(ky, (B, nCluster), jnp.float32), axis=1)
    z = jax.random.normal(kz, (B, nLatent), jnp.float32)
    params = init_params(kp, nGene, nLatent, nCluster)

    prepped_f32 = prepare_params(params, compute_dtype=jnp.float32)
    logits, probs = gene_inference_forward(y, z, prepped_f32, n_gene=nGene,
                                           probs_dtype=jnp.float32)
    jax.block_until_ready((logits, probs))
    ref_logits, ref_probs = reference_forward(y, z, params)
    assert logits.shape == (B, nGene) and probs.shape == (B, nGene)
    assert jnp.allclose(logits, ref_logits, atol=2e-3, rtol=2e-3)
    assert jnp.allclose(probs, ref_probs, atol=2e-3, rtol=2e-3)

    # ---- test 2: multi batch tile (3) x multi gene tile (2, partial last) ----
    B2, nGene2 = 300, 2500
    ky2, kz2, kp2 = jax.random.split(jax.random.PRNGKey(1), 3)
    y2 = jax.nn.softmax(jax.random.normal(ky2, (B2, nCluster), jnp.float32), axis=1)
    z2 = jax.random.normal(kz2, (B2, nLatent), jnp.float32)
    params2 = init_params(kp2, nGene2, nLatent, nCluster)

    prepped2_f32 = prepare_params(params2, compute_dtype=jnp.float32)
    l2, p2 = gene_inference_forward(y2, z2, prepped2_f32, n_gene=nGene2,
                                    probs_dtype=jnp.float32)
    jax.block_until_ready((l2, p2))
    rl2, rp2 = reference_forward(y2, z2, params2)
    assert l2.shape == (B2, nGene2) and p2.shape == (B2, nGene2)
    assert jnp.allclose(l2, rl2, atol=2e-3, rtol=2e-3)
    assert jnp.allclose(p2, rp2, atol=2e-3, rtol=2e-3)

    # ---- test 3: defaults (bf16 matmul operands, bf16 probs), looser check ----
    prepped2_bf16 = prepare_params(params2)                 # compute_dtype=bf16
    l3, p3 = gene_inference_forward(y2, z2, prepped2_bf16, n_gene=nGene2)
    jax.block_until_ready((l3, p3))
    assert l3.dtype == jnp.float32 and p3.dtype == jnp.bfloat16
    assert jnp.allclose(l3, rl2, atol=2e-1, rtol=2e-1)
    assert jnp.allclose(p3.astype(jnp.float32), rp2, atol=5e-2)

    print("KERNEL_OK")
</pallas_src>

<mosaic_0001>
module attributes {stable_mosaic.version = 11 : i64} {
  func.func @_gene_inference_kernel(%arg0: i32, %arg1: i32, %arg2: memref<8x32xf32, #tpu.memory_space<vmem>>, %arg3: memref<32x64xf32, #tpu.memory_space<vmem>>, %arg4: memref<1x64xf32, #tpu.memory_space<vmem>>, %arg5: memref<64x128xf32, #tpu.memory_space<vmem>>, %arg6: memref<1x128xf32, #tpu.memory_space<vmem>>, %arg7: memref<128x128xf32, #tpu.memory_space<vmem>>, %arg8: memref<1x128xf32, #tpu.memory_space<vmem>>, %arg9: memref<8x128xf32, #tpu.memory_space<vmem>>, %arg10: memref<8x128xf32, #tpu.memory_space<vmem>>) attributes {dimension_semantics = [#tpu.dimension_semantics<parallel>, #tpu.dimension_semantics<parallel>], iteration_bounds = array<i64: 1, 1>, scalar_prefetch = 0 : i64, scratch_operands = 0 : i64, tpu.core_type = #tpu.core_type<tc>, window_params = [{transform_indices = @transform_0, window_bounds = array<i64: 8, 32>}, {pipeline_mode = #tpu.pipeline_mode<synchronous>, transform_indices = @transform_1, window_bounds = array<i64: 32, 64>}, {pipeline_mode = #tpu.pipeline_mode<synchronous>, transform_indices = @transform_2, window_bounds = array<i64: 1, 64>}, {pipeline_mode = #tpu.pipeline_mode<synchronous>, transform_indices = @transform_3, window_bounds = array<i64: 64, 128>}, {pipeline_mode = #tpu.pipeline_mode<synchronous>, transform_indices = @transform_4, window_bounds = array<i64: 1, 128>}, {transform_indices = @transform_5, window_bounds = array<i64: 128, 128>}, {transform_indices = @transform_6, window_bounds = array<i64: 1, 128>}, {transform_indices = @transform_7, window_bounds = array<i64: 8, 128>}, {transform_indices = @transform_8, window_bounds = array<i64: 8, 128>}]} {
    %c0 = arith.constant 0 : index
    %c0_0 = arith.constant 0 : index
    %0 = vector.load %arg3[%c0, %c0_0] : memref<32x64xf32, #tpu.memory_space<vmem>>, vector<32x64xf32>
    %c0_1 = arith.constant 0 : index
    %c0_2 = arith.constant 0 : index
    %1 = vector.load %arg2[%c0_1, %c0_2] : memref<8x32xf32, #tpu.memory_space<vmem>>, vector<8x32xf32>
    %cst = arith.constant dense<0.000000e+00> : vector<8x64xf32>
    %2 = tpu.matmul %1, %0, %cst {dimension_numbers = #tpu.dot_dimension_numbers<[1], [0], [0], [1], [0, 0, 1, 1], [], []>} : vector<8x32xf32>, vector<32x64xf32>, vector<8x64xf32> -> vector<8x64xf32>
    %c0_3 = arith.constant 0 : index
    %c0_4 = arith.constant 0 : index
    %3 = vector.load %arg4[%c0_3, %c0_4] : memref<1x64xf32, #tpu.memory_space<vmem>>, vector<1x64xf32>
    %4 = vector.broadcast %3 : vector<1x64xf32> to vector<8x64xf32>
    %5 = arith.addf %2, %4 : vector<8x64xf32>
    %cst_5 = arith.constant 0.000000e+00 : f32
    %6 = vector.broadcast %cst_5 : f32 to vector<8x64xf32>
    %7 = arith.cmpf ogt, %5, %6 : vector<8x64xf32>
    %cst_6 = arith.constant 2.000000e-01 : f32
    %8 = vector.broadcast %cst_6 : f32 to vector<8x64xf32>
    %9 = arith.mulf %8, %5 : vector<8x64xf32>
    %10 = arith.select %7, %5, %9 : vector<8x64xi1>, vector<8x64xf32>
    %c0_7 = arith.constant 0 : index
    %c0_8 = arith.constant 0 : index
    %11 = vector.load %arg5[%c0_7, %c0_8] : memref<64x128xf32, #tpu.memory_space<vmem>>, vector<64x128xf32>
    %cst_9 = arith.constant dense<0.000000e+00> : vector<8x128xf32>
    %12 = tpu.matmul %10, %11, %cst_9 {dimension_numbers = #tpu.dot_dimension_numbers<[1], [0], [0], [1], [0, 0, 1, 1], [], []>} : vector<8x64xf32>, vector<64x128xf32>, vector<8x128xf32> -> vector<8x128xf32>
    %c0_10 = arith.constant 0 : index
    %c0_11 = arith.constant 0 : index
    %13 = vector.load %arg6[%c0_10, %c0_11] : memref<1x128xf32, #tpu.memory_space<vmem>>, vector<1x128xf32>
    %14 = vector.broadcast %13 : vector<1x128xf32> to vector<8x128xf32>
    %15 = arith.addf %12, %14 : vector<8x128xf32>
    %cst_12 = arith.constant 0.000000e+00 : f32
    %16 = vector.broadcast %cst_12 : f32 to vector<8x128xf32>
    %17 = arith.cmpf ogt, %15, %16 : vector<8x128xf32>
    %cst_13 = arith.constant 2.000000e-01 : f32
    %18 = vector.broadcast %cst_13 : f32 to vector<8x128xf32>
    %19 = arith.mulf %18, %15 : vector<8x128xf32>
    %20 = arith.select %17, %15, %19 : vector<8x128xi1>, vector<8x128xf32>
    %c0_14 = arith.constant 0 : index
    %c0_15 = arith.constant 0 : index
    %21 = vector.load %arg7[%c0_14, %c0_15] : memref<128x128xf32, #tpu.memory_space<vmem>>, vector<128x128xf32>
    %cst_16 = arith.constant dense<0.000000e+00> : vector<8x128xf32>
    %22 = tpu.matmul %20, %21, %cst_16 {dimension_numbers = #tpu.dot_dimension_numbers<[1], [0], [0], [1], [0, 0, 1, 1], [], []>} : vector<8x128xf32>, vector<128x128xf32>, vector<8x128xf32> -> vector<8x128xf32>
    %c0_17 = arith.constant 0 : index
    %c0_18 = arith.constant 0 : index
    %23 = vector.load %arg8[%c0_17, %c0_18] : memref<1x128xf32, #tpu.memory_space<vmem>>, vector<1x128xf32>
    %24 = vector.broadcast %23 : vector<1x128xf32> to vector<8x128xf32>
    %25 = arith.addf %22, %24 : vector<8x128xf32>
    %c0_19 = arith.constant 0 : index
    %c0_20 = arith.constant 0 : index
    %26 = vector.load %arg9[%c0_19, %c0_20] : memref<8x128xf32, #tpu.memory_space<vmem>>, vector<8x128xf32>
    tpu.vector_store %arg9[%c0_19, %c0_20], %25 {strides = array<i32>} : memref<8x128xf32, #tpu.memory_space<vmem>>, vector<8x128xf32>,
    %27 = arith.negf %25 : vector<8x128xf32>
    %28 = math.exp %27 : vector<8x128xf32>
    %cst_21 = arith.constant 1.000000e+00 : f32
    %29 = vector.broadcast %cst_21 : f32 to vector<8x128xf32>
    %30 = arith.addf %29, %28 : vector<8x128xf32>
    %31 = arith.divf %29, %30 : vector<8x128xf32>
    %c0_22 = arith.constant 0 : index
    %c0_23 = arith.constant 0 : index
    %32 = vector.load %arg10[%c0_22, %c0_23] : memref<8x128xf32, #tpu.memory_space<vmem>>, vector<8x128xf32>
    tpu.vector_store %arg10[%c0_22, %c0_23], %31 {strides = array<i32>} : memref<8x128xf32, #tpu.memory_space<vmem>>, vector<8x128xf32>,
    return
  }
  func.func @transform_0(%arg0: i32, %arg1: i32) -> (i32, i32) {
    %c0_i32 = arith.constant 0 : i32
    %c0_i32_0 = arith.constant 0 : i32
    return %arg0, %c0_i32 : i32, i32
  }
  func.func @transform_1(%arg0: i32, %arg1: i32) -> (i32, i32) {
    %c0_i32 = arith.constant 0 : i32
    %c0_i32_0 = arith.constant 0 : i32
    %c0_i32_1 = arith.constant 0 : i32
    return %c0_i32, %c0_i32_0 : i32, i32
  }
  func.func @transform_2(%arg0: i32, %arg1: i32) -> (i32, i32) {
    %c0_i32 = arith.constant 0 : i32
    %c0_i32_0 = arith.constant 0 : i32
    %c0_i32_1 = arith.constant 0 : i32
    return %c0_i32, %c0_i32_0 : i32, i32
  }
  func.func @transform_3(%arg0: i32, %arg1: i32) -> (i32, i32) {
    %c0_i32 = arith.constant 0 : i32
    %c0_i32_0 = arith.constant 0 : i32
    %c0_i32_1 = arith.constant 0 : i32
    return %c0_i32, %c0_i32_0 : i32, i32
  }
  func.func @transform_4(%arg0: i32, %arg1: i32) -> (i32, i32) {
    %c0_i32 = arith.constant 0 : i32
    %c0_i32_0 = arith.constant 0 : i32
    %c0_i32_1 = arith.constant 0 : i32
    return %c0_i32, %c0_i32_0 : i32, i32
  }
  func.func @transform_5(%arg0: i32, %arg1: i32) -> (i32, i32) {
    %c0_i32 = arith.constant 0 : i32
    %c0_i32_0 = arith.constant 0 : i32
    return %c0_i32, %arg1 : i32, i32
  }
  func.func @transform_6(%arg0: i32, %arg1: i32) -> (i32, i32) {
    %c0_i32 = arith.constant 0 : i32
    %c0_i32_0 = arith.constant 0 : i32
    return %c0_i32, %arg1 : i32, i32
  }
  func.func @transform_7(%arg0: i32, %arg1: i32) -> (i32, i32) {
    %c0_i32 = arith.constant 0 : i32
    return %arg0, %arg1 : i32, i32
  }
  func.func @transform_8(%arg0: i32, %arg1: i32) -> (i32, i32) {
    %c0_i32 = arith.constant 0 : i32
    return %arg0, %arg1 : i32, i32
  }
}

</mosaic_0001>

<bundles_post_ra>
// kernel: gene_inference_forward.1
= control target key start
LH: loop header
LB: loop body
LE: loop exit
PB: predicated region body
PF: predicated region fallthrough
CT: control target
= control target key end

     0   :  { %14 = vsyncpa [#allocation3], 0  ;;  %s766_s0 = inlined_call_operand.vmem [shape: f32[8,32], index: 0, kind: input, shape index: {}]   ;;  %s767_s1 = inlined_call_operand.vmem [shape: f32[32,64], index: 1, kind: input, shape index: {}]   ;;  %s768_s2 = inlined_call_operand.vmem [shape: f32[1,64], index: 2, kind: input, shape index: {}]   ;;  %s769_s3 = inlined_call_operand.hbm [shape: f32[64,128], index: 3, kind: input, shape index: {}]   ;;  %s770_s4 = inlined_call_operand.vmem [shape: f32[1,128], index: 4, kind: input, shape index: {}]   ;;  %s771_s5 = inlined_call_operand.hbm [shape: f32[128,128], index: 5, kind: input, shape index: {}]   ;;  %s772_s6 = inlined_call_operand.vmem [shape: f32[1,128], index: 6, kind: input, shape index: {}]   ;;  %s773_s7 = inlined_call_operand.hbm [shape: f32[8,128], index: 7, kind: output, shape index: {0}]   ;;  %s774_s8 = inlined_call_operand.hbm [shape: f32[8,128], index: 8, kind: output, shape index: {1}]  }
   0x1   :  { %15 = vsyncpa [#allocation6], 0 }
   0x2   :  { %16 = vsyncpa [#allocation4], 0 }
   0x3   :  { %17 = vsyncpa [#allocation9], 0  ;;  %s623_s27 = smov [#allocation2]   ;;  %s527_s9 = scalar_lea.hbm %s769_s3, 1024 }
   0x4   :  { %s29_s28 = sshll.u32 %s623_s27, 4  ;;  %p528_p0 = scmp.ne.s32.totalorder %s769_s3, %s527_s9  ;;  %s30_s28 = int_to_ptr.vmem [resolvable:$true] %s29_s28 }
   0x5   :  { %p531_p1 = scmp.lt.u32.totalorder %s527_s9, %s769_s3 }
   0x7   :  { %p533_p2 = pnand %p531_p1, %p528_p0 }
   0x9   :  { %536 = shalt.err (!%p533_p2)
}
   0xa   :  { %s537_s14 = scalar_lea.vmem %s30_s28, 1024  ;;  %p542_p4 = scmp.lt.s32.totalorder %s30_s28, %s30_s28 }
   0xb   :  { %p538_p3 = scmp.ne.s32.totalorder %s30_s28, %s537_s14  ;;  %p543_p5 = scmp.lt.s32.totalorder %s537_s14, %s537_s14 }
   0xd   :  { %p544_p6 = por %p543_p5, %p542_p4 }
   0xf   :  { %p545_p7 = pnand %p544_p6, %p538_p3 }
  0x11   :  { %548 = shalt.err (!%p545_p7)
}
  0x12   :  { %s624_s15 = smov 128   ;;  %s625_s16 = smov 8  }
  0x13   :  { %35 = dma.hbm_to_vmem [thread:$0]  %s769_s3, 1024, %s30_s28, [#allocation3], %s624_s15, %s624_s15, %s625_s16  }
  0x14   :  { %s626_s19 = smov [#allocation5]   ;;  %s549_s23 = scalar_lea.hbm %s771_s5, 2048 }
  0x15   :  { %s43_s20 = sshll.u32 %s626_s19, 4  ;;  %p550_p8 = scmp.ne.s32.totalorder %s771_s5, %s549_s23  ;;  %s44_s20 = int_to_ptr.vmem [resolvable:$true] %s43_s20 }
  0x16   :  { %p553_p9 = scmp.lt.u32.totalorder %s549_s23, %s771_s5 }
  0x18   :  { %p555_p10 = pnand %p553_p9, %p550_p8 }
  0x1a   :  { %558 = shalt.err (!%p555_p10)
}
  0x1b   :  { %s559_s29 = scalar_lea.vmem %s44_s20, 2048  ;;  %p564_p12 = scmp.lt.s32.totalorder %s44_s20, %s44_s20 }
  0x1c   :  { %p560_p11 = scmp.ne.s32.totalorder %s44_s20, %s559_s29  ;;  %p565_p13 = scmp.lt.s32.totalorder %s559_s29, %s559_s29 }
  0x1e   :  { %p566_p0 = por %p565_p13, %p564_p12 }
  0x20   :  { %p567_p1 = pnand %p566_p0, %p560_p11 }
  0x22   :  { %570 = shalt.err (!%p567_p1)
}
  0x23   :  { %49 = dma.hbm_to_vmem [thread:$0]  %s771_s5, 2048, %s44_s20, [#allocation6], %s624_s15, %s624_s15, %s625_s16  }
  0x24   :  { %615 = dma.done.wait [#allocation3], 1024  }
  0x25   :  { %616 = vsyncadd [#allocation3], 4294966272 }
  0x26   :  { %617 = dma.done.wait [#allocation6], 2048  }
  0x27   :  { %618 = vsyncadd [#allocation6], 4294965248  ;;  %v627_v0 = vmov 0.0|0.0   ;;  %vm628_vm0 = vmmov 0   ;;  %v629_v1 = vmov 0.0   ;;  %v58_v2 = vld [vmem:[%s767_s1] sm:$0xff] }
  0x28   :  { %472 = vmatprep.subr.bf16.mxu1 %v627_v0  ;;  %415 = vmatprep.mubr.msk.f32.mxu1 %vm628_vm0, %v629_v1  ;;  %v59_v3 = vld [vmem:[%s767_s1 + $0x8] sm:$0xff]  ;;  %v60_v4 = vld [vmem:[%s767_s1 + $0x10] sm:$0xff]  ;;  %v61_v6 = vld [vmem:[%s767_s1 + $0x18] sm:$0xff]  ;;  %vm70_vm1 = vcmask 261120   ;;  %vm162_vm3 = vcmask 523264   ;;  %s630_s20 = smov [#allocation7]  }
  0x29   :  { %490 = vmatprep.subr.bf16.mxu0 %v627_v0  ;;  %469 = vmatprep.mubr.msk.f32.mxu0 %vm628_vm0, %v629_v1  ;;  %v473_v5 = vpack.c.bf16 %v59_v3, %v58_v2  ;;  %v476_v7 = vpack.c.bf16 %v61_v6, %v60_v4  ;;  %v147_v8 = vld [vmem:[#allocation2] sm:$0xff]  ;;  %v148_v9 = vld [vmem:[#allocation2 + $0x8] sm:$0xff]  ;;  %v149_v12 = vld [vmem:[#allocation2 + $0x10] sm:$0xff]  ;;  %s346_s21 = sshll.u32 %s630_s20, 4  ;;  %s347_s21 = int_to_ptr.vmem [resolvable:$true] %s346_s21 }
  0x2a   :  { %v62_v10 = vld [vmem:[%s766_s0] sm:$0xff]  ;;  %v479_v11 = vpack.c.bf16 %v148_v9, %v147_v8  ;;  %v150_v13 = vld [vmem:[#allocation2 + $0x18] sm:$0xff]  ;;  %v152_v16 = vld [vmem:[#allocation2 + $0x28] sm:$0xff]  ;;  %p576_p3 = scmp.lt.s32.totalorder %s347_s21, %s347_s21 }
  0x2b   :  { %474 = vmatpush3.bf16.msra.mxu1 %v473_v5  ;;  %v482_v14 = vpack.c.bf16 %v150_v13, %v149_v12  ;;  %v151_v15 = vld [vmem:[#allocation2 + $0x20] sm:$0xff]  ;;  %v153_v18 = vld [vmem:[#allocation2 + $0x30] sm:$0xff]  ;;  %v154_v19 = vld [vmem:[#allocation2 + $0x38] sm:$0xff] }
  0x2c   :  { %475 = vmatprep.subr.bf16.mxu1 %v627_v0  ;;  %v485_v17 = vpack.c.bf16 %v152_v16, %v151_v15  ;;  %v488_v20 = vpack.c.bf16 %v154_v19, %v153_v18  ;;  %v239_v21 = vld [vmem:[#allocation5] sm:$0xff]  ;;  %v240_v22 = vld [vmem:[#allocation5 + $0x8] sm:$0xff]  ;;  %v241_v23 = vld [vmem:[#allocation5 + $0x10] sm:$0xff] }
  0x2d   :  { %v491_v24 = vpack.c.bf16 %v240_v22, %v239_v21  ;;  %v242_v25 = vld [vmem:[#allocation5 + $0x18] sm:$0xff]  ;;  %v243_v27 = vld [vmem:[#allocation5 + $0x20] sm:$0xff]  ;;  %v244_v28 = vld [vmem:[#allocation5 + $0x28] sm:$0xff] }
  0x2e   :  { %v494_v26 = vpack.c.bf16 %v242_v25, %v241_v23  ;;  %v497_v29 = vpack.c.bf16 %v244_v28, %v243_v27  ;;  %v245_v30 = vld [vmem:[#allocation5 + $0x30] sm:$0xff]  ;;  %v246_v31 = vld [vmem:[#allocation5 + $0x38] sm:$0xff]  ;;  %v247_v33 = vld [vmem:[#allocation5 + $0x40] sm:$0xff] }
  0x2f   :  { %477 = vmatpush3.bf16.msra.mxu1 %v476_v7  ;;  %492 = vmatpush3.bf16.msra.mxu0 %v491_v24  ;;  %v500_v32 = vpack.c.bf16 %v246_v31, %v245_v30  ;;  %v248_v34 = vld [vmem:[#allocation5 + $0x48] sm:$0xff]  ;;  %v249_v36 = vld [vmem:[#allocation5 + $0x50] sm:$0xff]  ;;  %v250_v37 = vld [vmem:[#allocation5 + $0x58] sm:$0xff] }
  0x30   :  { %478 = vmatprep.subr.bf16.mxu1 %v627_v0  ;;  %493 = vmatprep.subr.bf16.mxu0 %v627_v0  ;;  %v503_v35 = vpack.c.bf16 %v248_v34, %v247_v33  ;;  %v506_v38 = vpack.c.bf16 %v250_v37, %v249_v36  ;;  %v251_v39 = vld [vmem:[#allocation5 + $0x60] sm:$0xff]  ;;  %v252_v40 = vld [vmem:[#allocation5 + $0x68] sm:$0xff]  ;;  %v253_v48 = vld [vmem:[#allocation5 + $0x70] sm:$0xff] }
  0x31   :  { %v509_v41 = vpack.c.bf16 %v252_v40, %v251_v39  ;;  %v370_v42 = vld [vmem:[%s768_s2] ss:$0 sm:$0xff]  ;;  %v254_v49 = vld [vmem:[#allocation5 + $0x78] sm:$0xff] }
  0x32   :  { %416 = vmatmul.mubr.msk.f32.vlgmr.msra.gmra.mrb[0].mxu1 %vm70_vm1, %v62_v10  ;;  %v512_v50 = vpack.c.bf16 %v254_v49, %v253_v48  ;;  %v372_v51 = vld [vmem:[%s770_s4] ss:$0 sm:$0xff]  ;;  %s571_s4 = scalar_lea.vmem %s347_s21, 128 }
  0x33   :  { %480 = vmatpush3.bf16.msra.mxu1 %v479_v11  ;;  %434 = vmatprep.mubr.msk.f32.mxu1 %vm628_vm0, %v629_v1  ;;  %v374_v57 = vld [vmem:[%s772_s6] ss:$0 sm:$0xff]  ;;  %p572_p2 = scmp.ne.s32.totalorder %s347_s21, %s571_s4  ;;  %p577_p4 = scmp.lt.s32.totalorder %s571_s4, %s571_s4 }
  0x34   :  { %481 = vmatprep.subr.bf16.mxu1 %v627_v0  ;;  %495 = vmatpush3.bf16.msra.mxu0 %v494_v26 }
  0x35   :  { %496 = vmatprep.subr.bf16.mxu0 %v627_v0  ;;  %p578_p5 = por %p577_p4, %p576_p3 }
  0x37   :  { %483 = vmatpush3.bf16.msra.mxu1 %v482_v14  ;;  %p579_p6 = pnand %p578_p5, %p572_p2 }
  0x38   :  { %484 = vmatprep.subr.bf16.mxu1 %v627_v0  ;;  %498 = vmatpush3.bf16.msra.mxu0 %v497_v29 }
  0x39   :  { %499 = vmatprep.subr.bf16.mxu0 %v627_v0 }
  0x3b   :  { %486 = vmatpush3.bf16.msra.mxu1 %v485_v17 }
  0x3c   :  { %487 = vmatprep.subr.bf16.mxu1 %v627_v0  ;;  %501 = vmatpush3.bf16.msra.mxu0 %v500_v32 }
  0x3d   :  { %502 = vmatprep.subr.bf16.mxu0 %v627_v0 }
  0x3f   :  { %489 = vmatpush3.bf16.msra.mxu1 %v488_v20 }
  0x40   :  { %504 = vmatpush3.bf16.msra.mxu0 %v503_v35 }
  0x41   :  { %505 = vmatprep.subr.bf16.mxu0 %v627_v0 }
  0x44   :  { %507 = vmatpush3.bf16.msra.mxu0 %v506_v38 }
  0x45   :  { %508 = vmatprep.subr.bf16.mxu0 %v627_v0 }
  0x48   :  { %510 = vmatpush3.bf16.msra.mxu0 %v509_v41 }
  0x49   :  { %511 = vmatprep.subr.bf16.mxu0 %v627_v0 }
  0x4c   :  { %513 = vmatpush3.bf16.msra.mxu0 %v512_v50 }
 0x105   :  { %v140_v43 = vpop.f32.mrb[0].mxu1 }
 0x106   :  { %v141_v44 = vadd.f32 %v370_v42, %v140_v43  ;;  %v417_v45 = vpop.f32.mrb[1].mxu1 }
 0x108   :  { %vm144_vm2 = vcmp.gt.f32.partialorder %v141_v44, 0.0  ;;  %v145_v46 = vmul.f32 0.2, %v141_v44 }
 0x10a   :  { %v146_v47 = vsel %vm144_vm2, %v141_v44, %v145_v46 }
 0x10b   :  { %435 = vmatmul.mubr.msk.f32.vlgmr.msra.gmra.mrb[2].mxu1 %vm162_vm3, %v146_v47 }
 0x1de   :  { %v232_v52 = vpop.f32.mrb[2].mxu1 }
 0x1df   :  { %v233_v53 = vadd.f32 %v372_v51, %v232_v52  ;;  %v436_v54 = vpop.f32.mrb[3].mxu1 }
 0x1e1   :  { %v237_v55 = vmul.f32 0.2, %v233_v53  ;;  %vm236_vm4 = vcmp.gt.f32.partialorder %v233_v53, 0.0 }
 0x1e3   :  { %v238_v56 = vsel %vm236_vm4, %v233_v53, %v237_v55 }
 0x1e4   :  { %470 = vmatmul.mubr.f32.vlgmr.msra.gmra.mrb[0].mxu0 %v238_v56 }
 0x2b7   :  { %v328_v58 = vpop.f32.mrb[0].mxu0 }
 0x2b8   :  { %v329_v59 = vadd.f32 %v374_v57, %v328_v58  ;;  %v471_v60 = vpop.f32.mrb[1].mxu0 }
 0x2ba   :  { %v375_v61 = vmul.f32 -1.442695, %v329_v59  ;;  %332 = vst [vmem:[#allocation7] sm:$0xff] %v329_v59 }
 0x2bb   :  { %582 = shalt.err (!%p579_p6)
}
 0x2bc   :  { %s583_s24 = scalar_lea.hbm %s773_s7, 128 }
 0x2bd   :  { %p584_p7 = scmp.ne.s32.totalorder %s773_s7, %s583_s24  ;;  %p587_p8 = scmp.lt.u32.totalorder %s583_s24, %s773_s7 }
 0x2bf   :  { %p589_p9 = pnand %p587_p8, %p584_p7 }
 0x2c1   :  { %592 = shalt.err (!%p589_p9)
}
 0x2c2   :  { %349 = dma.vmem_to_hbm [thread:$0]  %s347_s21, 128, %s773_s7, [#allocation4]   ;;  %523 = vpow2.f32 %v375_v61 }
 0x2c3   :  { %s631_s28 = smov [#allocation8]  }
 0x2c4   :  { %s356_s30 = sshll.u32 %s631_s28, 4  ;;  %s357_s30 = int_to_ptr.vmem [resolvable:$true] %s356_s30 }
 0x2c5   :  { %s593_s9 = scalar_lea.vmem %s357_s30, 128  ;;  %p598_p11 = scmp.lt.s32.totalorder %s357_s30, %s357_s30 }
 0x2c6   :  { %p594_p10 = scmp.ne.s32.totalorder %s357_s30, %s593_s9  ;;  %p599_p12 = scmp.lt.s32.totalorder %s593_s9, %s593_s9 }
 0x2c8   :  { %p600_p13 = por %p599_p12, %p598_p11 }
 0x2ca   :  { %p601_p0 = pnand %p600_p13, %p594_p10 }
 0x2cc   :  { %v524_v62 = vpop.eup %523 }
 0x2cd   :  { %v336_v63 = vadd.f32 1.0, %v524_v62 }
 0x2cf   :  { %525 = vrcp.f32 %v336_v63 }
 0x2d9   :  { %v526_v0 = vpop.eup %525 }
 0x2da   :  { %339 = vst [vmem:[#allocation8] sm:$0xff] %v526_v0 }
 0x2db   :  { %604 = shalt.err (!%p601_p0)
}
 0x2dc   :  { %s605_s7 = scalar_lea.hbm %s774_s8, 128 }
 0x2dd   :  { %p606_p1 = scmp.ne.s32.totalorder %s774_s8, %s605_s7  ;;  %p609_p2 = scmp.lt.u32.totalorder %s605_s7, %s774_s8 }
 0x2df   :  { %p611_p3 = pnand %p609_p2, %p606_p1 }
 0x2e1   :  { %614 = shalt.err (!%p611_p3)
}
 0x2e2   :  { %359 = dma.vmem_to_hbm [thread:$0]  %s357_s30, 128, %s774_s8, [#allocation9]  }
 0x2e3   :  { %619 = dma.done.wait [#allocation4], 128  }
 0x2e4   :  { %620 = vsyncadd [#allocation4], 4294967168 }
 0x2e5   :  { %621 = dma.done.wait [#allocation9], 128  }
 0x2e6   :  { %622 = vsyncadd [#allocation9], 4294967168 }
 0x2e7   :  { %366 = vsyncpa [#allocation3], 1 }
 0x2e8   :  { %367 = vsyncpa [#allocation6], 1 }
 0x2e9   :  { %368 = vsyncpa [#allocation4], 1 }
 0x2ea   :  { %369 = vsyncpa [#allocation9], 1 }

</bundles_post_ra>
